<compile_context>
chip_gen: v6e
topology: v6e:2x2x1
jax: 0.10.0
libtpu: 0.0.40
codegen_flags: <defaults>
</compile_context>

<pallas_src>
import jax
import jax.numpy as jnp
from jax.experimental import pallas as pl
from jax.experimental.pallas import tpu as pltpu


def _pick_hw_tile(hw, cin, cout, *, max_tile=2048, vmem_budget=20 * 2**20):
    """Pick a lane-dense H*W tile that divides hw and fits the VMEM budget."""
    # Double-buffered f32 x-tile + out-tile bytes per output column.
    per_col = 4 * (cin + cout) * 2
    cap = max(128, (vmem_budget // per_col) // 128 * 128)
    if hw % 128 == 0:
        t = min(hw, max_tile, cap)
        t = (t // 128) * 128
        while hw % t != 0:          # largest multiple of 128 dividing hw
            t -= 128
        return t
    # Fallback (uncommon for detector feature maps): one full block.
    # Legal because a block dim equal to the full array dim is always allowed.
    return hw


# --------------------------------------------------------------------------
# Pallas kernel: one fused  (Cout, Cin) @ (Cin, T_HW) + bias  step.
# No K reduction axis (Cin fits a single block), so no accumulator/pl.when.
# --------------------------------------------------------------------------
def _head_matmul_kernel(x_ref, w_ref, b_ref, o_ref):
    # x_ref: (Cin, T_HW)   w_ref: (Cout, Cin)   b_ref: (Cout, 1)
    y = jnp.dot(w_ref[...], x_ref[...], preferred_element_type=jnp.float32)
    o_ref[...] = (y + b_ref[...]).astype(o_ref.dtype)


# --------------------------------------------------------------------------
# Head forward (matches the torch module) + pure-JAX reference
# --------------------------------------------------------------------------
def head_forward(x_nchw, w_oc, b, task_len, *, max_hw_tile=2048):
    """Pallas Head forward.

    x_nchw : (N, Cin, H, W) f32   -- same NCHW layout torch's Head receives
    w_oc   : (A*T, Cin)     f32   -- nn.Conv2d(cin, A*T, 1).weight[:, :, 0, 0]
    b      : (A*T,)         f32   -- conv bias
    returns  (N, H*W*A, T)  f32   -- conv -> permute(0,2,3,1) -> reshape
    """
    N, C, H, W = x_nchw.shape
    cout = w_oc.shape[0]
    assert cout % task_len == 0
    num_anchors = cout // task_len
    HW = H * W

    x3 = x_nchw.reshape(N, C, HW)                    # free reshape, native layout
    b2 = b.reshape(cout, 1).astype(jnp.float32)
    t_hw = _pick_hw_tile(HW, C, cout, max_tile=max_hw_tile)
    grid = (N, HW // t_hw)

    y = pl.pallas_call(
        _head_matmul_kernel,
        out_shape=jax.ShapeDtypeStruct((N, cout, HW), jnp.float32),
        grid_spec=pltpu.PrefetchScalarGridSpec(
            num_scalar_prefetch=0,
            grid=grid,
            in_specs=[
                # x tile: batch dim squeezed, Cin resident, H*W tiled (lane axis)
                pl.BlockSpec((None, C, t_hw), lambda n, j: (n, 0, j)),
                # weight: fully resident (tiny)
                pl.BlockSpec((cout, C), lambda n, j: (0, 0)),
                # bias: fully resident
                pl.BlockSpec((cout, 1), lambda n, j: (0, 0)),
            ],
            out_specs=pl.BlockSpec((None, cout, t_hw), lambda n, j: (n, 0, j)),
        ),
        compiler_params=pltpu.CompilerParams(
            dimension_semantics=("parallel", "parallel"),
            vmem_limit_bytes=64 * 1024 * 1024,
        ),
    )(x3, w_oc.astype(jnp.float32), b2)

    # Tiny post-kernel permute (touches only Cout channels per pixel):
    # (N, Cout, HW) -> (N, HW, Cout) -> (N, HW*A, T)
    return jnp.transpose(y, (0, 2, 1)).reshape(N, HW * num_anchors, task_len)


def head_reference(x_nchw, w_oc, b, task_len):
    """Pure-JAX f32 reference identical to the torch module's forward."""
    y = jnp.einsum("nchw,oc->nohw", x_nchw, w_oc,
                   precision=jax.lax.Precision.HIGHEST) + b[None, :, None, None]
    y = jnp.transpose(y, (0, 2, 3, 1))
    return y.reshape(y.shape[0], -1, task_len)


# --------------------------------------------------------------------------
if __name__ == "__main__":
    # Small shapes consistent with the module: batch=2, cin=64 feature maps at
    # 16x16 spatial, num_anchors=3.  Exercise both a box head (task_len=4) and
    # a class head (task_len=2) — both are instances of `Head`.
    B, CIN, H, W = 2, 64, 16, 16
    NUM_ANCHORS = 3

    key = jax.random.PRNGKey(0)
    kx, kwb, kbb, kwc, kbc = jax.random.split(key, 5)
    x = jax.random.normal(kx, (B, CIN, H, W), dtype=jnp.float32)

    heads = {
        "box": dict(task_len=4,
                    w=0.1 * jax.random.normal(kwb, (NUM_ANCHORS * 4, CIN), jnp.float32),
                    b=0.1 * jax.random.normal(kbb, (NUM_ANCHORS * 4,), jnp.float32)),
        "cls": dict(task_len=2,
                    w=0.1 * jax.random.normal(kwc, (NUM_ANCHORS * 2, CIN), jnp.float32),
                    b=0.1 * jax.random.normal(kbc, (NUM_ANCHORS * 2,), jnp.float32)),
    }

    for name, p in heads.items():
        out = head_forward(x, p["w"], p["b"], p["task_len"])
        out = jax.block_until_ready(out)
        ref = head_reference(x, p["w"], p["b"], p["task_len"])

        assert out.shape == (B, H * W * NUM_ANCHORS, p["task_len"]), (name, out.shape)
        assert bool(jnp.all(jnp.isfinite(out))), name
        err = float(jnp.max(jnp.abs(out - ref)))
        scale = float(jnp.max(jnp.abs(ref))) + 1e-6
        # f32 operands / f32 accumulation -> tight tolerance vs f32 reference
        assert err <= 5e-3 * scale + 5e-3, (name, err, scale)

    print("KERNEL_OK")
</pallas_src>

<mosaic_0001>
module attributes {stable_mosaic.version = 11 : i64} {
  func.func @_head_matmul_kernel(%arg0: i32, %arg1: i32, %arg2: memref<1x64x256xf32, #tpu.memory_space<vmem>>, %arg3: memref<12x64xf32, #tpu.memory_space<vmem>>, %arg4: memref<12x1xf32, #tpu.memory_space<vmem>>, %arg5: memref<1x12x256xf32, #tpu.memory_space<vmem>>) attributes {dimension_semantics = [#tpu.dimension_semantics<parallel>, #tpu.dimension_semantics<parallel>], iteration_bounds = array<i64: 2, 1>, scalar_prefetch = 0 : i64, scratch_operands = 0 : i64, tpu.core_type = #tpu.core_type<tc>, window_params = [{transform_indices = @transform_0, window_bounds = array<i64: 1, 64, 256>}, {pipeline_mode = #tpu.pipeline_mode<synchronous>, transform_indices = @transform_1, window_bounds = array<i64: 12, 64>}, {pipeline_mode = #tpu.pipeline_mode<synchronous>, transform_indices = @transform_2, window_bounds = array<i64: 12, 1>}, {transform_indices = @transform_3, window_bounds = array<i64: 1, 12, 256>}]} {
    %c0 = arith.constant 0 : index
    %c0_0 = arith.constant 0 : index
    %0 = vector.load %arg3[%c0, %c0_0] : memref<12x64xf32, #tpu.memory_space<vmem>>, vector<12x64xf32>
    %c0_1 = arith.constant 0 : index
    %c0_2 = arith.constant 0 : index
    %c0_3 = arith.constant 0 : index
    %1 = vector.load %arg2[%c0_1, %c0_2, %c0_3] : memref<1x64x256xf32, #tpu.memory_space<vmem>>, vector<1x64x256xf32>
    %2 = vector.shape_cast %1 : vector<1x64x256xf32> to vector<64x256xf32>
    %cst = arith.constant dense<0.000000e+00> : vector<12x256xf32>
    %3 = tpu.matmul %0, %2, %cst {dimension_numbers = #tpu.dot_dimension_numbers<[1], [0], [0], [1], [0, 0, 1, 1], [], []>} : vector<12x64xf32>, vector<64x256xf32>, vector<12x256xf32> -> vector<12x256xf32>
    %c0_4 = arith.constant 0 : index
    %c0_5 = arith.constant 0 : index
    %4 = vector.load %arg4[%c0_4, %c0_5] : memref<12x1xf32, #tpu.memory_space<vmem>>, vector<12x1xf32>
    %5 = vector.broadcast %4 : vector<12x1xf32> to vector<12x256xf32>
    %6 = arith.addf %3, %5 : vector<12x256xf32>
    %c0_6 = arith.constant 0 : index
    %c0_7 = arith.constant 0 : index
    %c0_8 = arith.constant 0 : index
    %7 = vector.load %arg5[%c0_6, %c0_7, %c0_8] : memref<1x12x256xf32, #tpu.memory_space<vmem>>, vector<1x12x256xf32>
    %8 = vector.shape_cast %7 : vector<1x12x256xf32> to vector<12x256xf32>
    %9 = vector.shape_cast %6 : vector<12x256xf32> to vector<1x12x256xf32>
    tpu.vector_store %arg5[%c0_6, %c0_7, %c0_8], %9 {strides = array<i32>} : memref<1x12x256xf32, #tpu.memory_space<vmem>>, vector<1x12x256xf32>,
    return
  }
  func.func @transform_0(%arg0: i32, %arg1: i32) -> (i32, i32, i32) {
    %c0_i32 = arith.constant 0 : i32
    %c0_i32_0 = arith.constant 0 : i32
    return %arg0, %c0_i32, %arg1 : i32, i32, i32
  }
  func.func @transform_1(%arg0: i32, %arg1: i32) -> (i32, i32) {
    %c0_i32 = arith.constant 0 : i32
    %c0_i32_0 = arith.constant 0 : i32
    %c0_i32_1 = arith.constant 0 : i32
    return %c0_i32, %c0_i32_0 : i32, i32
  }
  func.func @transform_2(%arg0: i32, %arg1: i32) -> (i32, i32) {
    %c0_i32 = arith.constant 0 : i32
    %c0_i32_0 = arith.constant 0 : i32
    %c0_i32_1 = arith.constant 0 : i32
    return %c0_i32, %c0_i32_0 : i32, i32
  }
  func.func @transform_3(%arg0: i32, %arg1: i32) -> (i32, i32, i32) {
    %c0_i32 = arith.constant 0 : i32
    %c0_i32_0 = arith.constant 0 : i32
    return %arg0, %c0_i32, %arg1 : i32, i32, i32
  }
}

</mosaic_0001>

<bundles_post_ra>
// kernel: tpu_custom_call.1
= control target key start
LH: loop header
LB: loop body
LE: loop exit
PB: predicated region body
PF: predicated region fallthrough
CT: control target
= control target key end

     0   :  { %8 = vsyncpa [#allocation3], 0  ;;  %s756_s0 = inlined_call_operand.hbm [shape: f32[2,64,256], index: 0, kind: input, shape index: {}]   ;;  %s757_s1 = inlined_call_operand.vmem [shape: f32[12,64], index: 1, kind: input, shape index: {}]   ;;  %s758_s2 = inlined_call_operand.vmem [shape: f32[12,1], index: 2, kind: input, shape index: {}]   ;;  %s759_s3 = inlined_call_operand.vmem [shape: f32[2,12,256], index: 3, kind: output, shape index: {}]  }
   0x1   :  { %10 = vsyncpa [#allocation3 + $0x1], 0  ;;  %s630_s12 = smov 0   ;;  %s632_s13 = smov 0  }
   0x2   :  { %s634_s14 = smov 0   ;;  %s636_s15 = smov 0  }
   0x3   :  { %s638_s16 = smov 0   ;;  %s640_s17 = smov 0  }
   0x4 LB: > { %s432_s18 = sadd.s32 4294967295, %s603_s17   ;;  %s28_s19 = sadd.s32 1, %s599_s16  ;;  %s603_s17 = sphi %s640_s17, %s16_s17   ;;  %s599_s16 = sphi %s638_s16, %s767_s16   ;;  %s595_s15 = sphi %s636_s15, %s766_s15   ;;  %s591_s14 = sphi %s634_s14, %s765_s14   ;;  %s587_s13 = sphi %s632_s13, %s764_s13   ;;  %s583_s12 = sphi %s630_s12, %s763_s12  }
   0x5   : > { %p30_p0 = scmp.ge.s32.totalorder %s28_s19, 2  ;;  %s37_s20 = sadd.s32 1, %s591_s14 }
   0x6   : > { %p44_p1 = scmp.ne.s32.totalorder %s591_s14, %s587_s13  ;;  %p45_p2 = scmp.eq.s32.totalorder %s603_s17, 0 }
   0x7   : > { %s769_s19 = smov (%p30_p0, %s28_s19), 0  ;;  %p50_p4 = scmp.ne.s32.totalorder %s587_s13, %s583_s12 }
   0x8   : > { %p666_p3 = por %p45_p2, %p44_p1  ;;  %s32_s22 = ssub.s32 %s599_s16, %s769_s19 }
   0x9   : > { %p51_p5 = scmp.eq.s32.totalorder %s432_s18, 0  ;;  %p35_p6 = scmp.eq.s32.totalorder %s32_s22, 0 }
   0xa   : > { %p471_p8 = scmp.lt.s32.totalorder %s603_s17, 2  ;;  %s150_s25 = sand.u32 1, %s591_s14  }
   0xb   : > { %p673_p7 = por %p51_p5, %p50_p4  ;;  %s447_s26 = sshll.u32 %s599_s16, 11 }
   0xc   : > { %s679_s24 = scalar_select %p35_p6, %s591_s14, %s37_s20  }
   0xd   : > { %s436_s27 = sshll.u32 %s150_s25, 7  ;;  %s162_s30 = scalar_lea.hbm %s756_s0, %s447_s26 }
   0xe   : > { %s154_s4 = scalar_lea.vmem [#allocation2], %s436_s27  ;;  %p688_p9 = pnand %p471_p8, %p666_p3 }
   0xf   : > { %s163_s5 = sshll.u32 %s154_s4, 4  ;;  %s151_s7 = scalar_lea.sflag [#allocation3], %s150_s25  ;;  %s164_s5 = int_to_ptr.vmem [resolvable:$true] %s163_s5 }
  0x10   : > { %p527_p10 = pneg %p688_p9  ;;  %s538_s8 = scalar_lea.vmem %s164_s5, 2048 }
  0x11   : > { %p539_p11 = scmp.ne.s32.totalorder %s164_s5, %s538_s8  ;;  %s605_s9 = smov [#allocation2]  }
  0x12   : > { %s543_s10 = sshll.u32 %s605_s9, 4  ;;  %s544_s10 = int_to_ptr.vmem [resolvable:$false] %s543_s10 }
  0x13   : > { %p541_p12 = pnand %p539_p11, %p527_p10  ;;  %s545_s11 = scalar_lea.vmem %s544_s10, 4096 }
  0x14   : > { %p546_p0 = scmp.lt.s32.totalorder %s164_s5, %s544_s10  ;;  %p547_p1 = scmp.lt.s32.totalorder %s545_s11, %s538_s8 }
  0x15   : > { %p542_p13 = pneg %p541_p12 }
  0x16   : > { %p548_p2 = por %p547_p1, %p546_p0 }
  0x18   : > { %p549_p3 = pnand %p548_p2, %p542_p13 }
  0x1a   : > { %552 = shalt.err (!%p549_p3)
}
  0x1b   : > { %s606_s12 = smov 256   ;;  %s607_s18 = smov 16  }
  0x1c   : > { %470 = dma.hbm_to_vmem [thread:$0]  (!%p688_p9), %s162_s30, 2048, %s164_s5, %s151_s7, %s606_s12, %s606_s12, %s607_s18  }
  0x1d   : > { %p439_p4 = scmp.ge.s32.totalorder %s603_s17, 1  ;;  %p171_p5 = scmp.lt.s32.totalorder %s603_s17, 3 }
  0x1f   : > { %p172_p6 = pnand %p439_p4, %p171_p5 }
  0x20   : > { %s177_s20 = sand.u32 (!%p172_p6), 1, %s587_s13  }
  0x21   : > { %175 = sbr.rel (%p172_p6) target bundleno = 256 (0x100), region = 32  ;;  %s440_s21 = sshll.u32 (!%p172_p6), %s177_s20, 7 }
  0x22   : > { %s178_s22 = scalar_lea.sflag (!%p172_p6), [#allocation3], %s177_s20  ;;  %s699_s25 = scalar_lea.vmem (!%p172_p6), [#allocation2], %s440_s21 }
  0x26   : > { %578 = dma.done.wait (%p673_p7), %s178_s22, 2048  }
  0x27   : > { %580 = vsyncadd (%p673_p7), %s178_s22, 4294965248  ;;  %v608_v0 = vmov 0.0   ;;  %v609_v1 = vmov 0   ;;  %v236_v2 = vld [vmem:[%s699_s25 + $0x78] sm:$0xff]  ;;  %v235_v3 = vld [vmem:[%s699_s25 + $0x70] sm:$0xff]  ;;  %vm249_vm0 = vcmask 523264  }
  0x28   : > { %320 = vmatprep.mubr.f32.mxu0 %v608_v0  ;;  %326 = vmatprep.mubr.f32.mxu1 %v608_v0  ;;  %v234_v4 = vld [vmem:[%s699_s25 + $0x68] sm:$0xff]  ;;  %v233_v5 = vld [vmem:[%s699_s25 + $0x60] sm:$0xff]  ;;  %v232_v6 = vld [vmem:[%s699_s25 + $0x58] sm:$0xff]  ;;  %p210_p7 = scmp.lt.s32.totalorder %s595_s15, 1 }
  0x29   : > { %524 = vset.pattern.permute.xlu0 %v609_v1  ;;  %272 = vmatprep.subr.mxu0 %v236_v2  ;;  %v231_v7 = vld [vmem:[%s699_s25 + $0x50] sm:$0xff]  ;;  %v230_v8 = vld [vmem:[%s699_s25 + $0x48] sm:$0xff]  ;;  %v229_v9 = vld [vmem:[%s699_s25 + $0x40] sm:$0xff] }
  0x2a   : > { %449 = vmatprep.subr.mxu1 %v236_v2  ;;  %273 = vmatpush1.msra.mxu0 %v235_v3  ;;  %v228_v10 = vld [vmem:[%s699_s25 + $0x38] sm:$0xff]  ;;  %v227_v11 = vld [vmem:[%s699_s25 + $0x30] sm:$0xff]  ;;  %v226_v12 = vld [vmem:[%s699_s25 + $0x28] sm:$0xff]  ;;  %s771_s15 = smov (!%p210_p7, %s595_s15), 1 }
  0x2b   : > { %457 = vmatpush1.msra.mxu1 %v235_v3  ;;  %274 = vmatprep.subr.mxu0 %v234_v4  ;;  %v225_v13 = vld [vmem:[%s699_s25 + $0x20] sm:$0xff]  ;;  %v224_v14 = vld [vmem:[%s699_s25 + $0x18] sm:$0xff]  ;;  %v223_v15 = vld [vmem:[%s699_s25 + $0x10] sm:$0xff]  ;;  %s448_s6 = sshll.u32 %s771_s15, 5 }
  0x2c   : > { %450 = vmatprep.subr.mxu1 %v234_v4  ;;  %275 = vmatpush1.msra.mxu0 %v233_v5  ;;  %v222_v16 = vld [vmem:[%s699_s25 + $0x8] sm:$0xff]  ;;  %v221_v17 = vld [vmem:[%s699_s25] sm:$0xff]  ;;  %s217_s9 = scalar_lea.vmem %s759_s3, %s448_s6 }
  0x2d   : > { %458 = vmatpush1.msra.mxu1 %v233_v5  ;;  %276 = vmatprep.subr.mxu0 %v232_v6  ;;  %v219_v18 = vld [vmem:[%s757_s1] sm:$0xff]  ;;  %v220_v19 = vld [vmem:[%s757_s1 + $0x8] sm:$0xf] }
  0x2e   : > { %451 = vmatprep.subr.mxu1 %v232_v6  ;;  %277 = vmatpush1.msra.mxu0 %v231_v7  ;;  %v237_v20 = vld [vmem:[%s758_s2] sm:$0xff]  ;;  %v238_v21 = vld [vmem:[%s758_s2 + $0x8] sm:$0xf] }
  0x2f   : > { %459 = vmatpush1.msra.mxu1 %v231_v7  ;;  %278 = vmatprep.subr.mxu0 %v230_v8 }
  0x30   : > { %452 = vmatprep.subr.mxu1 %v230_v8  ;;  %279 = vmatpush1.msra.mxu0 %v229_v9 }
  0x31   : > { %460 = vmatpush1.msra.mxu1 %v229_v9  ;;  %280 = vmatprep.subr.mxu0 %v228_v10 }
  0x32   : > { %453 = vmatprep.subr.mxu1 %v228_v10  ;;  %281 = vmatpush1.msra.mxu0 %v227_v11 }
  0x33   : > { %461 = vmatpush1.msra.mxu1 %v227_v11  ;;  %282 = vmatprep.subr.mxu0 %v226_v12 }
  0x34   : > { %454 = vmatprep.subr.mxu1 %v226_v12  ;;  %283 = vmatpush1.msra.mxu0 %v225_v13 }
  0x35   : > { %462 = vmatpush1.msra.mxu1 %v225_v13  ;;  %284 = vmatprep.subr.mxu0 %v224_v14 }
  0x36   : > { %455 = vmatprep.subr.mxu1 %v224_v14  ;;  %285 = vmatpush1.msra.mxu0 %v223_v15 }
  0x37   : > { %463 = vmatpush1.msra.mxu1 %v223_v15  ;;  %286 = vmatprep.subr.mxu0 %v222_v16 }
  0x38   : > { %456 = vmatprep.subr.mxu1 %v222_v16  ;;  %287 = vmatpush1.msra.mxu0 %v221_v17 }
  0x39   : > { %464 = vmatpush1.msra.mxu1 %v221_v17  ;;  %443 = vmatmul.mubr.msk.f32.vlgmr.msra.gmra.mxu0 %vm249_vm0, %v219_v18 }
  0x3a   : > { %444 = vmatmul.mubr.msk.f32.vlgmr.msra.gmra.mxu1 %vm249_vm0, %v220_v19  ;;  %241 = vperm.xlu0 %524, %v237_v20  }
  0x3e   : > { %246 = vperm.xlu0 %524, %v238_v21  }
  0xb5   : > { %v242_v22 = vpop.permute.xlu0 %241 }
  0xb9   : > { %v247_v23 = vpop.permute.xlu0 %246 }
  0xf9   : > { %v322_v24 = vpop.f32.mrf.mxu0 }
  0xfa   : > { %v328_v25 = vpop.f32.mrf.mxu1  ;;  %v323_v26 = vadd.f32 %v322_v24, %v242_v22 }
  0xfb   : > { %v329_v27 = vadd.f32 %v328_v25, %v247_v23  ;;  %v324_v28 = vpop.f32.mrf.mxu0 }
  0xfc   : > { %v330_v29 = vpop.f32.mrf.mxu1  ;;  %333 = vst [vmem:[%s217_s9] sm:$0xff] %v323_v26  ;;  %v325_v30 = vadd.f32 %v324_v28, %v242_v22 }
  0xfd   : > { %335 = vst [vmem:[%s217_s9 + $0x10] sm:$0xf] %v329_v27  ;;  %v331_v31 = vadd.f32 %v330_v29, %v247_v23 }
  0xfe   : > { %334 = vst [vmem:[%s217_s9 + $0x8] sm:$0xff] %v325_v30 }
  0xff   : > { %336 = vst [vmem:[%s217_s9 + $0x18] sm:$0xf] %v331_v31 }
 0x100 PF: > { %s16_s17 = sadd.s32 1, %s603_s17   ;;  %s763_s12 = smov %s587_s13 }
 0x101   : > { %p13_p8 = scmp.ge.s32.totalorder %s16_s17, 4   ;;  %s764_s13 = smov %s591_s14 }
 0x102   : > { %s765_s14 = smov %s679_s24  ;;  %s766_s15 = smov %s599_s16 }
 0x103   : > { %s767_s16 = smov %s769_s19  ;;  %15 = sbr.rel (!%p13_p8) target bundleno = 4 (0x4), region = 72 }
 0x108   :  { %367 = vsyncpa [#allocation3], 1 }
 0x109   :  { %369 = vsyncpa [#allocation3 + $0x1], 1 }

</bundles_post_ra>
